<compile_context>
chip_gen: v6e
topology: v6e:2x2x1
jax: 0.10.0
libtpu: 0.0.40
codegen_flags: <defaults>
</compile_context>

<pallas_src>
import functools

import jax
import jax.numpy as jnp
from jax.experimental import pallas as pl
from jax.experimental.pallas import tpu as pltpu

_LANE = 128


def _pad_to(n: int, m: int) -> int:
    return max(m, ((n + m - 1) // m) * m)


def _is_multi_tc_chip() -> bool:
    """True on chips exposing 2 TensorCores per device (v4 / v5p megacore, v7x)."""
    try:
        kind = jax.devices()[0].device_kind.lower()
    except Exception:
        return True  # unknown -> keep >=2 parallel grid steps to be safe
    return any(tag in kind for tag in ("v7", "v5p", "v4"))


def _vmem_budget_bytes() -> int:
    try:
        kind = jax.devices()[0].device_kind.lower()
    except Exception:
        kind = ""
    if "v7" in kind:
        return 36 << 20   # 64 MiB physical VMEM per TC on v7x -> leave headroom
    return 64 << 20       # 128 MiB physical on v5e / v6e


def _choose_batch_tile(B, k, per_row_stream_bytes, per_row_scratch_bytes,
                       resident_bytes, budget_bytes, prefer_multi_step):
    """Largest batch tile (divisor of B, <=1024 rows) whose footprint fits VMEM.

    Single-TC chips: grid is a sequential loop -> largest fitting tile wins.
    2-TC chips: prefer >=2 (ideally an even number of) grid steps for balance.
    """
    cap = max(1, 1024 // k)   # diminishing returns above ~1024 matmul rows

    def footprint(tb):
        rows = tb * k
        return resident_bytes + rows * (2 * per_row_stream_bytes + per_row_scratch_bytes)

    divisors = [tb for tb in range(min(B, cap), 0, -1) if B % tb == 0]
    fitting = [tb for tb in divisors if footprint(tb) <= budget_bytes] or [divisors[-1]]
    if prefer_multi_step:
        multi = [tb for tb in fitting if B // tb >= 2]
        if multi:
            even = [tb for tb in multi if (B // tb) % 2 == 0]
            return max(even) if even else max(multi)
    return max(fitting)


def _make_fused_kernel(num_layers: int, bf16_matmul: bool):
    def kernel(*refs):
        # refs = (x, r0, w0, s0, b0, ..., r_{L-1}, w_{L-1}, s_{L-1}, b_{L-1}, out)
        x_ref = refs[0]
        o_ref = refs[-1]
        layer_refs = refs[1:-1]

        tb, k, _ = x_ref.shape
        x = x_ref[...].astype(jnp.float32)                         # (tb, k, d_in)
        for li in range(num_layers):
            r_ref, w_ref, s_ref, b_ref = layer_refs[4 * li:4 * li + 4]
            d_in, d_out = w_ref.shape
            # Per-member input adapter: broadcast native (k, d_in) over tb (VPU).
            xr = x * r_ref[...][None, :, :]
            lhs = xr.reshape(tb * k, d_in)                          # free merge (k % 8 == 0)
            if bf16_matmul:
                lhs = lhs.astype(jnp.bfloat16)                      # W already bf16 (cast once in wrapper)
            y = jnp.dot(lhs, w_ref[...],
                        preferred_element_type=jnp.float32)         # MXU, f32 accumulate
            y = y.reshape(tb, k, d_out)
            x = jnp.maximum(y * s_ref[...][None, :, :] + b_ref[...][None, :, :], 0.0)
            # TODO(synk): dropout_rate=0 in the reference module -> identity; a
            # nonzero rate would need pltpu.prng_seed / prng_random_bits here.
        o_ref[...] = x.astype(o_ref.dtype)

    return kernel


def tabm_apply(params, x_bkd, *, bf16_matmul=False, single_buffer_weights=True):
    """TabM forward. x_bkd: (B, k, in_features) -> (B, k, hidden_sizes[-1])."""
    B, k, d_in0 = x_bkd.shape
    num_layers = len(params)
    d_out_last = params[-1]["w"].shape[1]

    w_dtype = jnp.bfloat16 if bf16_matmul else jnp.float32
    w_bytes = jnp.dtype(w_dtype).itemsize
    x_bytes = jnp.dtype(x_bkd.dtype).itemsize
    nbuf_w = 1 if single_buffer_weights else 2

    # ---- Pad layer OUTPUT widths to a multiple of 128 lanes (exact in f32:
    # padded W/s/b entries are zero -> padded lanes stay zero through ReLU and
    # feed zero rows of the next layer).  The streamed input width is untouched.
    prepared = []
    resident_bytes = 0
    sum_padded_out = 0
    d_in_p = d_in0
    for layer in params:
        d_in, d_out = layer["w"].shape
        d_out_p = _pad_to(d_out, _LANE)
        w = jnp.zeros((d_in_p, d_out_p), jnp.float32).at[:d_in, :d_out].set(layer["w"])
        r = jnp.ones((k, d_in_p), jnp.float32).at[:, :d_in].set(layer["r"])
        s = jnp.zeros((k, d_out_p), jnp.float32).at[:, :d_out].set(layer["s"])
        b = jnp.zeros((k, d_out_p), jnp.float32).at[:, :d_out].set(layer["b"])
        w = w.astype(w_dtype)   # bf16 cast happens ONCE here, not per grid step
        prepared.append((r, w, s, b))
        resident_bytes += nbuf_w * (w.size * w_bytes + (r.size + s.size + b.size) * 4)
        sum_padded_out += d_out_p
        d_in_p = d_out_p
    d_last_p = d_in_p

    # ---- Generation-aware tile pick + explicit scoped-VMEM limit.
    per_row_stream = d_in0 * x_bytes + d_last_p * x_bytes      # double-buffered x / out tiles
    per_row_scratch = 4 * (d_in0 + sum_padded_out)             # f32 intermediates headroom
    tb = _choose_batch_tile(B, k, per_row_stream, per_row_scratch,
                            resident_bytes, _vmem_budget_bytes(), _is_multi_tc_chip())
    rows = tb * k
    footprint = resident_bytes + rows * (2 * per_row_stream + per_row_scratch)
    vmem_limit = max(8 << 20, min(int(footprint * 3 // 2) + (2 << 20), 64 << 20))
    grid = (B // tb,)

    weight_mode = dict(pipeline_mode=pl.Buffered(1)) if single_buffer_weights else {}

    inputs = [x_bkd]
    in_specs = [pl.BlockSpec((tb, k, d_in0), lambda i: (i, 0, 0))]
    for (r, w, s, b) in prepared:
        d_in, d_out = w.shape
        inputs += [r, w, s, b]
        # Native (k, d) adapters + shared W: constant index_map => fetched once
        # and VMEM-resident across all row tiles (no (B*k, d) pre-tiled streams).
        in_specs += [
            pl.BlockSpec((k, d_in), lambda i: (0, 0), **weight_mode),
            pl.BlockSpec((d_in, d_out), lambda i: (0, 0), **weight_mode),
            pl.BlockSpec((k, d_out), lambda i: (0, 0), **weight_mode),
            pl.BlockSpec((k, d_out), lambda i: (0, 0), **weight_mode),
        ]

    out = pl.pallas_call(
        _make_fused_kernel(num_layers, bf16_matmul),
        out_shape=jax.ShapeDtypeStruct((B, k, d_last_p), x_bkd.dtype),
        grid_spec=pltpu.PrefetchScalarGridSpec(
            num_scalar_prefetch=0,
            grid=grid,
            in_specs=in_specs,
            out_specs=pl.BlockSpec((tb, k, d_last_p), lambda i: (i, 0, 0)),
        ),
        compiler_params=pltpu.CompilerParams(
            dimension_semantics=("parallel",),
            vmem_limit_bytes=vmem_limit),
    )(*inputs)
    return out[..., :d_out_last]


def init_tabm_params(key, in_features, hidden_sizes, k):
    """Deterministic parameter init for the TabM stack."""
    layer_sizes = [in_features] + list(hidden_sizes)
    params = []
    for i in range(len(layer_sizes) - 1):
        d_in, d_out = layer_sizes[i], layer_sizes[i + 1]
        key, kw, kb = jax.random.split(key, 3)
        bound = 1.0 / jnp.sqrt(jnp.float32(d_in))
        w = jax.random.uniform(kw, (d_in, d_out), jnp.float32, -bound, bound)
        bias = jax.random.uniform(kb, (1, d_out), jnp.float32, -bound, bound)
        bias = jnp.broadcast_to(bias, (k, d_out))             # per-member bias
        r = jnp.ones((k, d_in), jnp.float32)                  # initialize_to_1
        s = jnp.ones((k, d_out), jnp.float32)                 # initialize_to_1
        params.append({"r": r, "w": w, "s": s, "b": bias})
    return params


def _reference(params, x_bkd):
    """Pure-JAX reference for sanity checking (PyTorch layout / semantics)."""
    x = x_bkd  # (B, k, d)
    for layer in params:
        xr = x * layer["r"][None, :, :]
        y = jnp.einsum("bki,io->bko", xr, layer["w"],
                       preferred_element_type=jnp.float32)
        x = jnp.maximum(y * layer["s"][None, :, :] + layer["b"][None, :, :], 0.0)
    return x


if __name__ == "__main__":
    key = jax.random.PRNGKey(0)
    B = 4
    k = 32
    in_features = 16
    hidden_sizes = [32, 64]

    key, kp, kx = jax.random.split(key, 3)
    params = init_tabm_params(kp, in_features, hidden_sizes, k)
    x = jax.random.normal(kx, (B, k, in_features), jnp.float32)

    ref = _reference(params, x)

    def run(bf16, single_buffer):
        fn = jax.jit(functools.partial(tabm_apply, bf16_matmul=bf16,
                                       single_buffer_weights=single_buffer))
        return jax.block_until_ready(fn(params, x))

    try:
        out = run(False, True)
        single_buffer_ok = True
    except Exception:
        # pipeline_mode=pl.Buffered(1) unsupported on this jax/libtpu build:
        # fall back to default double-buffered (still VMEM-resident) weights.
        out = run(False, False)
        single_buffer_ok = False

    assert out.shape == (B, k, hidden_sizes[-1]), out.shape
    assert jnp.allclose(out, ref, atol=1e-4, rtol=1e-4), "f32 mismatch vs reference"

    # bf16-weight path (recommended default on v5e): bf16 MXU inputs, f32 accumulate.
    out_bf16 = run(True, single_buffer_ok)
    assert out_bf16.shape == (B, k, hidden_sizes[-1]), out_bf16.shape
    assert jnp.allclose(out_bf16, ref, atol=5e-2, rtol=5e-2), "bf16 mismatch vs reference"

    print("KERNEL_OK")
</pallas_src>

<mosaic_0001>
module attributes {stable_mosaic.version = 11 : i64} {
  func.func @kernel(%arg0: i32, %arg1: memref<4x32x16xf32, #tpu.memory_space<vmem>>, %arg2: memref<32x16xf32, #tpu.memory_space<vmem>>, %arg3: memref<16x128xf32, #tpu.memory_space<vmem>>, %arg4: memref<32x128xf32, #tpu.memory_space<vmem>>, %arg5: memref<32x128xf32, #tpu.memory_space<vmem>>, %arg6: memref<32x128xf32, #tpu.memory_space<vmem>>, %arg7: memref<128x128xf32, #tpu.memory_space<vmem>>, %arg8: memref<32x128xf32, #tpu.memory_space<vmem>>, %arg9: memref<32x128xf32, #tpu.memory_space<vmem>>, %arg10: memref<4x32x128xf32, #tpu.memory_space<vmem>>) attributes {dimension_semantics = [#tpu.dimension_semantics<parallel>], iteration_bounds = array<i64: 1>, scalar_prefetch = 0 : i64, scratch_operands = 0 : i64, tpu.core_type = #tpu.core_type<tc>, window_params = [{transform_indices = @transform_0, window_bounds = array<i64: 4, 32, 16>}, {pipeline_mode = #tpu.pipeline_mode<synchronous>, transform_indices = @transform_1, window_bounds = array<i64: 32, 16>}, {pipeline_mode = #tpu.pipeline_mode<synchronous>, transform_indices = @transform_2, window_bounds = array<i64: 16, 128>}, {pipeline_mode = #tpu.pipeline_mode<synchronous>, transform_indices = @transform_3, window_bounds = array<i64: 32, 128>}, {pipeline_mode = #tpu.pipeline_mode<synchronous>, transform_indices = @transform_4, window_bounds = array<i64: 32, 128>}, {pipeline_mode = #tpu.pipeline_mode<synchronous>, transform_indices = @transform_5, window_bounds = array<i64: 32, 128>}, {pipeline_mode = #tpu.pipeline_mode<synchronous>, transform_indices = @transform_6, window_bounds = array<i64: 128, 128>}, {pipeline_mode = #tpu.pipeline_mode<synchronous>, transform_indices = @transform_7, window_bounds = array<i64: 32, 128>}, {pipeline_mode = #tpu.pipeline_mode<synchronous>, transform_indices = @transform_8, window_bounds = array<i64: 32, 128>}, {transform_indices = @transform_9, window_bounds = array<i64: 4, 32, 128>}]} {
    %c0 = arith.constant 0 : index
    %c0_0 = arith.constant 0 : index
    %c0_1 = arith.constant 0 : index
    %0 = vector.load %arg1[%c0, %c0_0, %c0_1] : memref<4x32x16xf32, #tpu.memory_space<vmem>>, vector<4x32x16xf32>
    %c0_2 = arith.constant 0 : index
    %c0_3 = arith.constant 0 : index
    %1 = vector.load %arg2[%c0_2, %c0_3] : memref<32x16xf32, #tpu.memory_space<vmem>>, vector<32x16xf32>
    %2 = vector.shape_cast %1 : vector<32x16xf32> to vector<1x32x16xf32>
    %3 = vector.broadcast %2 : vector<1x32x16xf32> to vector<4x32x16xf32>
    %4 = arith.mulf %0, %3 : vector<4x32x16xf32>
    %5 = vector.shape_cast %4 : vector<4x32x16xf32> to vector<128x16xf32>
    %c0_4 = arith.constant 0 : index
    %c0_5 = arith.constant 0 : index
    %6 = vector.load %arg3[%c0_4, %c0_5] : memref<16x128xf32, #tpu.memory_space<vmem>>, vector<16x128xf32>
    %cst = arith.constant dense<0.000000e+00> : vector<128x128xf32>
    %7 = tpu.matmul %5, %6, %cst {dimension_numbers = #tpu.dot_dimension_numbers<[1], [0], [0], [1], [0, 0, 1, 1], [], []>} : vector<128x16xf32>, vector<16x128xf32>, vector<128x128xf32> -> vector<128x128xf32>
    %8 = vector.shape_cast %7 : vector<128x128xf32> to vector<4x32x128xf32>
    %c0_6 = arith.constant 0 : index
    %c0_7 = arith.constant 0 : index
    %9 = vector.load %arg4[%c0_6, %c0_7] : memref<32x128xf32, #tpu.memory_space<vmem>>, vector<32x128xf32>
    %10 = vector.shape_cast %9 : vector<32x128xf32> to vector<1x32x128xf32>
    %11 = vector.broadcast %10 : vector<1x32x128xf32> to vector<4x32x128xf32>
    %12 = arith.mulf %8, %11 : vector<4x32x128xf32>
    %c0_8 = arith.constant 0 : index
    %c0_9 = arith.constant 0 : index
    %13 = vector.load %arg5[%c0_8, %c0_9] : memref<32x128xf32, #tpu.memory_space<vmem>>, vector<32x128xf32>
    %14 = vector.shape_cast %13 : vector<32x128xf32> to vector<1x32x128xf32>
    %15 = vector.broadcast %14 : vector<1x32x128xf32> to vector<4x32x128xf32>
    %16 = arith.addf %12, %15 : vector<4x32x128xf32>
    %cst_10 = arith.constant 0.000000e+00 : f32
    %17 = vector.broadcast %cst_10 : f32 to vector<4x32x128xf32>
    %18 = arith.maximumf %16, %17 : vector<4x32x128xf32>
    %c0_11 = arith.constant 0 : index
    %c0_12 = arith.constant 0 : index
    %19 = vector.load %arg6[%c0_11, %c0_12] : memref<32x128xf32, #tpu.memory_space<vmem>>, vector<32x128xf32>
    %20 = vector.shape_cast %19 : vector<32x128xf32> to vector<1x32x128xf32>
    %21 = vector.broadcast %20 : vector<1x32x128xf32> to vector<4x32x128xf32>
    %22 = arith.mulf %18, %21 : vector<4x32x128xf32>
    %23 = vector.shape_cast %22 : vector<4x32x128xf32> to vector<128x128xf32>
    %c0_13 = arith.constant 0 : index
    %c0_14 = arith.constant 0 : index
    %24 = vector.load %arg7[%c0_13, %c0_14] : memref<128x128xf32, #tpu.memory_space<vmem>>, vector<128x128xf32>
    %cst_15 = arith.constant dense<0.000000e+00> : vector<128x128xf32>
    %25 = tpu.matmul %23, %24, %cst_15 {dimension_numbers = #tpu.dot_dimension_numbers<[1], [0], [0], [1], [0, 0, 1, 1], [], []>} : vector<128x128xf32>, vector<128x128xf32>, vector<128x128xf32> -> vector<128x128xf32>
    %26 = vector.shape_cast %25 : vector<128x128xf32> to vector<4x32x128xf32>
    %c0_16 = arith.constant 0 : index
    %c0_17 = arith.constant 0 : index
    %27 = vector.load %arg8[%c0_16, %c0_17] : memref<32x128xf32, #tpu.memory_space<vmem>>, vector<32x128xf32>
    %28 = vector.shape_cast %27 : vector<32x128xf32> to vector<1x32x128xf32>
    %29 = vector.broadcast %28 : vector<1x32x128xf32> to vector<4x32x128xf32>
    %30 = arith.mulf %26, %29 : vector<4x32x128xf32>
    %c0_18 = arith.constant 0 : index
    %c0_19 = arith.constant 0 : index
    %31 = vector.load %arg9[%c0_18, %c0_19] : memref<32x128xf32, #tpu.memory_space<vmem>>, vector<32x128xf32>
    %32 = vector.shape_cast %31 : vector<32x128xf32> to vector<1x32x128xf32>
    %33 = vector.broadcast %32 : vector<1x32x128xf32> to vector<4x32x128xf32>
    %34 = arith.addf %30, %33 : vector<4x32x128xf32>
    %cst_20 = arith.constant 0.000000e+00 : f32
    %35 = vector.broadcast %cst_20 : f32 to vector<4x32x128xf32>
    %36 = arith.maximumf %34, %35 : vector<4x32x128xf32>
    %c0_21 = arith.constant 0 : index
    %c0_22 = arith.constant 0 : index
    %c0_23 = arith.constant 0 : index
    %37 = vector.load %arg10[%c0_21, %c0_22, %c0_23] : memref<4x32x128xf32, #tpu.memory_space<vmem>>, vector<4x32x128xf32>
    tpu.vector_store %arg10[%c0_21, %c0_22, %c0_23], %36 {strides = array<i32>} : memref<4x32x128xf32, #tpu.memory_space<vmem>>, vector<4x32x128xf32>,
    return
  }
  func.func @transform_0(%arg0: i32) -> (i32, i32, i32) {
    %c0_i32 = arith.constant 0 : i32
    %c0_i32_0 = arith.constant 0 : i32
    %c0_i32_1 = arith.constant 0 : i32
    return %arg0, %c0_i32, %c0_i32_0 : i32, i32, i32
  }
  func.func @transform_1(%arg0: i32) -> (i32, i32) {
    %c0_i32 = arith.constant 0 : i32
    %c0_i32_0 = arith.constant 0 : i32
    %c0_i32_1 = arith.constant 0 : i32
    return %c0_i32, %c0_i32_0 : i32, i32
  }
  func.func @transform_2(%arg0: i32) -> (i32, i32) {
    %c0_i32 = arith.constant 0 : i32
    %c0_i32_0 = arith.constant 0 : i32
    %c0_i32_1 = arith.constant 0 : i32
    return %c0_i32, %c0_i32_0 : i32, i32
  }
  func.func @transform_3(%arg0: i32) -> (i32, i32) {
    %c0_i32 = arith.constant 0 : i32
    %c0_i32_0 = arith.constant 0 : i32
    %c0_i32_1 = arith.constant 0 : i32
    return %c0_i32, %c0_i32_0 : i32, i32
  }
  func.func @transform_4(%arg0: i32) -> (i32, i32) {
    %c0_i32 = arith.constant 0 : i32
    %c0_i32_0 = arith.constant 0 : i32
    %c0_i32_1 = arith.constant 0 : i32
    return %c0_i32, %c0_i32_0 : i32, i32
  }
  func.func @transform_5(%arg0: i32) -> (i32, i32) {
    %c0_i32 = arith.constant 0 : i32
    %c0_i32_0 = arith.constant 0 : i32
    %c0_i32_1 = arith.constant 0 : i32
    return %c0_i32, %c0_i32_0 : i32, i32
  }
  func.func @transform_6(%arg0: i32) -> (i32, i32) {
    %c0_i32 = arith.constant 0 : i32
    %c0_i32_0 = arith.constant 0 : i32
    %c0_i32_1 = arith.constant 0 : i32
    return %c0_i32, %c0_i32_0 : i32, i32
  }
  func.func @transform_7(%arg0: i32) -> (i32, i32) {
    %c0_i32 = arith.constant 0 : i32
    %c0_i32_0 = arith.constant 0 : i32
    %c0_i32_1 = arith.constant 0 : i32
    return %c0_i32, %c0_i32_0 : i32, i32
  }
  func.func @transform_8(%arg0: i32) -> (i32, i32) {
    %c0_i32 = arith.constant 0 : i32
    %c0_i32_0 = arith.constant 0 : i32
    %c0_i32_1 = arith.constant 0 : i32
    return %c0_i32, %c0_i32_0 : i32, i32
  }
  func.func @transform_9(%arg0: i32) -> (i32, i32, i32) {
    %c0_i32 = arith.constant 0 : i32
    %c0_i32_0 = arith.constant 0 : i32
    %c0_i32_1 = arith.constant 0 : i32
    return %arg0, %c0_i32, %c0_i32_0 : i32, i32, i32
  }
}

module attributes {stable_mosaic.version = 11 : i64} {
  func.func @kernel(%arg0: i32, %arg1: memref<4x32x16xf32, #tpu.memory_space<vmem>>, %arg2: memref<32x16xf32, #tpu.memory_space<vmem>>, %arg3: memref<16x128xf32, #tpu.memory_space<vmem>>, %arg4: memref<32x128xf32, #tpu.memory_space<vmem>>, %arg5: memref<32x128xf32, #tpu.memory_space<vmem>>, %arg6: memref<32x128xf32, #tpu.memory_space<vmem>>, %arg7: memref<128x128xf32, #tpu.memory_space<vmem>>, %arg8: memref<32x128xf32, #tpu.memory_space<vmem>>, %arg9: memref<32x128xf32, #tpu.memory_space<vmem>>, %arg10: memref<4x32x128xf32, #tpu.memory_space<vmem>>) attributes {dimension_semantics = [#tpu.dimension_semantics<parallel>], iteration_bounds = array<i64: 1>, scalar_prefetch = 0 : i64, scratch_operands = 0 : i64, tpu.core_type = #tpu.core_type<tc>, window_params = [{transform_indices = @transform_0, window_bounds = array<i64: 4, 32, 16>}, {pipeline_mode = #tpu.pipeline_mode<synchronous>, transform_indices = @transform_1, window_bounds = array<i64: 32, 16>}, {pipeline_mode = #tpu.pipeline_mode<synchronous>, transform_indices = @transform_2, window_bounds = array<i64: 16, 128>}, {pipeline_mode = #tpu.pipeline_mode<synchronous>, transform_indices = @transform_3, window_bounds = array<i64: 32, 128>}, {pipeline_mode = #tpu.pipeline_mode<synchronous>, transform_indices = @transform_4, window_bounds = array<i64: 32, 128>}, {pipeline_mode = #tpu.pipeline_mode<synchronous>, transform_indices = @transform_5, window_bounds = array<i64: 32, 128>}, {pipeline_mode = #tpu.pipeline_mode<synchronous>, transform_indices = @transform_6, window_bounds = array<i64: 128, 128>}, {pipeline_mode = #tpu.pipeline_mode<synchronous>, transform_indices = @transform_7, window_bounds = array<i64: 32, 128>}, {pipeline_mode = #tpu.pipeline_mode<synchronous>, transform_indices = @transform_8, window_bounds = array<i64: 32, 128>}, {transform_indices = @transform_9, window_bounds = array<i64: 4, 32, 128>}]} {
    %c0 = arith.constant 0 : index
    %c0_0 = arith.constant 0 : index
    %c0_1 = arith.constant 0 : index
    %0 = vector.load %arg1[%c0, %c0_0, %c0_1] : memref<4x32x16xf32, #tpu.memory_space<vmem>>, vector<4x32x16xf32>
    %c0_2 = arith.constant 0 : index
    %c0_3 = arith.constant 0 : index
    %1 = vector.load %arg2[%c0_2, %c0_3] : memref<32x16xf32, #tpu.memory_space<vmem>>, vector<32x16xf32>
    %2 = vector.shape_cast %1 : vector<32x16xf32> to vector<1x32x16xf32>
    %3 = vector.broadcast %2 : vector<1x32x16xf32> to vector<4x32x16xf32>
    %4 = arith.mulf %0, %3 : vector<4x32x16xf32>
    %5 = vector.shape_cast %4 : vector<4x32x16xf32> to vector<128x16xf32>
    %c0_4 = arith.constant 0 : index
    %c0_5 = arith.constant 0 : index
    %6 = vector.load %arg3[%c0_4, %c0_5] : memref<16x128xf32, #tpu.memory_space<vmem>>, vector<16x128xf32>
    %cst = arith.constant dense<0.000000e+00> : vector<128x128xf32>
    %7 = tpu.matmul %5, %6, %cst {dimension_numbers = #tpu.dot_dimension_numbers<[1], [0], [0], [1], [0, 0, 1, 1], [], []>} : vector<128x16xf32>, vector<16x128xf32>, vector<128x128xf32> -> vector<128x128xf32>
    %8 = vector.shape_cast %7 : vector<128x128xf32> to vector<4x32x128xf32>
    %c0_6 = arith.constant 0 : index
    %c0_7 = arith.constant 0 : index
    %9 = vector.load %arg4[%c0_6, %c0_7] : memref<32x128xf32, #tpu.memory_space<vmem>>, vector<32x128xf32>
    %10 = vector.shape_cast %9 : vector<32x128xf32> to vector<1x32x128xf32>
    %11 = vector.broadcast %10 : vector<1x32x128xf32> to vector<4x32x128xf32>
    %12 = arith.mulf %8, %11 : vector<4x32x128xf32>
    %c0_8 = arith.constant 0 : index
    %c0_9 = arith.constant 0 : index
    %13 = vector.load %arg5[%c0_8, %c0_9] : memref<32x128xf32, #tpu.memory_space<vmem>>, vector<32x128xf32>
    %14 = vector.shape_cast %13 : vector<32x128xf32> to vector<1x32x128xf32>
    %15 = vector.broadcast %14 : vector<1x32x128xf32> to vector<4x32x128xf32>
    %16 = arith.addf %12, %15 : vector<4x32x128xf32>
    %cst_10 = arith.constant 0.000000e+00 : f32
    %17 = vector.broadcast %cst_10 : f32 to vector<4x32x128xf32>
    %18 = arith.maximumf %16, %17 : vector<4x32x128xf32>
    %c0_11 = arith.constant 0 : index
    %c0_12 = arith.constant 0 : index
    %19 = vector.load %arg6[%c0_11, %c0_12] : memref<32x128xf32, #tpu.memory_space<vmem>>, vector<32x128xf32>
    %20 = vector.shape_cast %19 : vector<32x128xf32> to vector<1x32x128xf32>
    %21 = vector.broadcast %20 : vector<1x32x128xf32> to vector<4x32x128xf32>
    %22 = arith.mulf %18, %21 : vector<4x32x128xf32>
    %23 = vector.shape_cast %22 : vector<4x32x128xf32> to vector<128x128xf32>
    %c0_13 = arith.constant 0 : index
    %c0_14 = arith.constant 0 : index
    %24 = vector.load %arg7[%c0_13, %c0_14] : memref<128x128xf32, #tpu.memory_space<vmem>>, vector<128x128xf32>
    %cst_15 = arith.constant dense<0.000000e+00> : vector<128x128xf32>
    %25 = tpu.matmul %23, %24, %cst_15 {dimension_numbers = #tpu.dot_dimension_numbers<[1], [0], [0], [1], [0, 0, 1, 1], [], []>} : vector<128x128xf32>, vector<128x128xf32>, vector<128x128xf32> -> vector<128x128xf32>
    %26 = vector.shape_cast %25 : vector<128x128xf32> to vector<4x32x128xf32>
    %c0_16 = arith.constant 0 : index
    %c0_17 = arith.constant 0 : index
    %27 = vector.load %arg8[%c0_16, %c0_17] : memref<32x128xf32, #tpu.memory_space<vmem>>, vector<32x128xf32>
    %28 = vector.shape_cast %27 : vector<32x128xf32> to vector<1x32x128xf32>
    %29 = vector.broadcast %28 : vector<1x32x128xf32> to vector<4x32x128xf32>
    %30 = arith.mulf %26, %29 : vector<4x32x128xf32>
    %c0_18 = arith.constant 0 : index
    %c0_19 = arith.constant 0 : index
    %31 = vector.load %arg9[%c0_18, %c0_19] : memref<32x128xf32, #tpu.memory_space<vmem>>, vector<32x128xf32>
    %32 = vector.shape_cast %31 : vector<32x128xf32> to vector<1x32x128xf32>
    %33 = vector.broadcast %32 : vector<1x32x128xf32> to vector<4x32x128xf32>
    %34 = arith.addf %30, %33 : vector<4x32x128xf32>
    %cst_20 = arith.constant 0.000000e+00 : f32
    %35 = vector.broadcast %cst_20 : f32 to vector<4x32x128xf32>
    %36 = arith.maximumf %34, %35 : vector<4x32x128xf32>
    %c0_21 = arith.constant 0 : index
    %c0_22 = arith.constant 0 : index
    %c0_23 = arith.constant 0 : index
    %37 = vector.load %arg10[%c0_21, %c0_22, %c0_23] : memref<4x32x128xf32, #tpu.memory_space<vmem>>, vector<4x32x128xf32>
    tpu.vector_store %arg10[%c0_21, %c0_22, %c0_23], %36 {strides = array<i32>} : memref<4x32x128xf32, #tpu.memory_space<vmem>>, vector<4x32x128xf32>,
    return
  }
  func.func @transform_0(%arg0: i32) -> (i32, i32, i32) {
    %c0_i32 = arith.constant 0 : i32
    %c0_i32_0 = arith.constant 0 : i32
    %c0_i32_1 = arith.constant 0 : i32
    return %arg0, %c0_i32, %c0_i32_0 : i32, i32, i32
  }
  func.func @transform_1(%arg0: i32) -> (i32, i32) {
    %c0_i32 = arith.constant 0 : i32
    %c0_i32_0 = arith.constant 0 : i32
    %c0_i32_1 = arith.constant 0 : i32
    return %c0_i32, %c0_i32_0 : i32, i32
  }
  func.func @transform_2(%arg0: i32) -> (i32, i32) {
    %c0_i32 = arith.constant 0 : i32
    %c0_i32_0 = arith.constant 0 : i32
    %c0_i32_1 = arith.constant 0 : i32
    return %c0_i32, %c0_i32_0 : i32, i32
  }
  func.func @transform_3(%arg0: i32) -> (i32, i32) {
    %c0_i32 = arith.constant 0 : i32
    %c0_i32_0 = arith.constant 0 : i32
    %c0_i32_1 = arith.constant 0 : i32
    return %c0_i32, %c0_i32_0 : i32, i32
  }
  func.func @transform_4(%arg0: i32) -> (i32, i32) {
    %c0_i32 = arith.constant 0 : i32
    %c0_i32_0 = arith.constant 0 : i32
    %c0_i32_1 = arith.constant 0 : i32
    return %c0_i32, %c0_i32_0 : i32, i32
  }
  func.func @transform_5(%arg0: i32) -> (i32, i32) {
    %c0_i32 = arith.constant 0 : i32
    %c0_i32_0 = arith.constant 0 : i32
    %c0_i32_1 = arith.constant 0 : i32
    return %c0_i32, %c0_i32_0 : i32, i32
  }
  func.func @transform_6(%arg0: i32) -> (i32, i32) {
    %c0_i32 = arith.constant 0 : i32
    %c0_i32_0 = arith.constant 0 : i32
    %c0_i32_1 = arith.constant 0 : i32
    return %c0_i32, %c0_i32_0 : i32, i32
  }
  func.func @transform_7(%arg0: i32) -> (i32, i32) {
    %c0_i32 = arith.constant 0 : i32
    %c0_i32_0 = arith.constant 0 : i32
    %c0_i32_1 = arith.constant 0 : i32
    return %c0_i32, %c0_i32_0 : i32, i32
  }
  func.func @transform_8(%arg0: i32) -> (i32, i32) {
    %c0_i32 = arith.constant 0 : i32
    %c0_i32_0 = arith.constant 0 : i32
    %c0_i32_1 = arith.constant 0 : i32
    return %c0_i32, %c0_i32_0 : i32, i32
  }
  func.func @transform_9(%arg0: i32) -> (i32, i32, i32) {
    %c0_i32 = arith.constant 0 : i32
    %c0_i32_0 = arith.constant 0 : i32
    %c0_i32_1 = arith.constant 0 : i32
    return %arg0, %c0_i32, %c0_i32_0 : i32, i32, i32
  }
}

</mosaic_0001>

<bundles_post_ra>
// kernel: tabm_apply.1
= control target key start
LH: loop header
LB: loop body
LE: loop exit
PB: predicated region body
PF: predicated region fallthrough
CT: control target
= control target key end

     0   :  { %vm71_vm0 = vcmask 130048   ;;  %s1187_s0 = inlined_call_operand.vmem [shape: f32[4,32,16], index: 0, kind: input, shape index: {}]   ;;  %s1188_s1 = inlined_call_operand.vmem [shape: f32[32,16], index: 1, kind: input, shape index: {}]   ;;  %s1189_s2 = inlined_call_operand.vmem [shape: f32[16,128], index: 2, kind: input, shape index: {}]   ;;  %s1190_s3 = inlined_call_operand.vmem [shape: f32[32,128], index: 3, kind: input, shape index: {}]   ;;  %s1191_s4 = inlined_call_operand.vmem [shape: f32[32,128], index: 4, kind: input, shape index: {}]   ;;  %s1192_s5 = inlined_call_operand.vmem [shape: f32[32,128], index: 5, kind: input, shape index: {}]   ;;  %s1193_s6 = inlined_call_operand.vmem [shape: f32[128,128], index: 6, kind: input, shape index: {}]   ;;  %s1194_s7 = inlined_call_operand.vmem [shape: f32[32,128], index: 7, kind: input, shape index: {}]   ;;  %s1195_s8 = inlined_call_operand.vmem [shape: f32[32,128], index: 8, kind: input, shape index: {}]   ;;  %s1196_s9 = inlined_call_operand.hbm [shape: f32[4,32,128], index: 9, kind: output, shape index: {}]  }
   0x1   :  { %v70_v0 = vld [vmem:[%s1189_s2 + $0x8] sm:$0xff]  ;;  %v69_v1 = vld [vmem:[%s1189_s2] sm:$0xff]  ;;  %v35_v8 = vld [vmem:[%s1187_s0 + $0x10] sm:$0xff] }
   0x2   :  { %v33_v2 = vld [vmem:[%s1187_s0] sm:$0xff]  ;;  %656 = vmatprep.subr.mxu0 %v70_v0  ;;  %v34_v4 = vld [vmem:[%s1187_s0 + $0x8] sm:$0xff]  ;;  %v880_v9 = vld [vmem:[%s1188_s1 + $0x10] sm:$0xff] }
   0x3   :  { %v862_v3 = vld [vmem:[%s1188_s1] sm:$0xff]  ;;  %v870_v5 = vld [vmem:[%s1188_s1 + $0x8] sm:$0xff]  ;;  %657 = vmatpush3.msra.mxu0 %v70_v0  ;;  %v36_v10 = vld [vmem:[%s1187_s0 + $0x18] sm:$0xff]  ;;  %v55_v11 = vmul.f32 %v880_v9, %v35_v8 }
   0x4   :  { %v53_v6 = vmul.f32 %v862_v3, %v33_v2  ;;  %v54_v7 = vmul.f32 %v870_v5, %v34_v4  ;;  %658 = vmatprep.subr.mxu0 %v69_v1  ;;  %v889_v12 = vld [vmem:[%s1188_s1 + $0x18] sm:$0xff]  ;;  %v37_v13 = vld [vmem:[%s1187_s0 + $0x20] sm:$0xff]  ;;  %v38_v16 = vld [vmem:[%s1187_s0 + $0x28] sm:$0xff] }
   0x5   :  { %659 = vmatpush3.msra.mxu0 %v69_v1  ;;  %v56_v14 = vmul.f32 %v889_v12, %v36_v10  ;;  %v57_v15 = vmul.f32 %v862_v3, %v37_v13  ;;  %v39_v17 = vld [vmem:[%s1187_s0 + $0x30] sm:$0xff]  ;;  %v356_v18 = vld [vmem:[%s1193_s6 + $0x78] sm:$0xff]  ;;  %v58_v20 = vmul.f32 %v870_v5, %v38_v16  ;;  %v354_v23 = vld [vmem:[%s1193_s6 + $0x68] sm:$0xff] }
   0x6   :  { %660 = vmatprep.mubr.msk.f32.mxu0 %vm71_vm0, %v53_v6  ;;  %684 = vmatprep.subr.mxu0 %v356_v18  ;;  %v355_v19 = vld [vmem:[%s1193_s6 + $0x70] sm:$0xff]  ;;  %v59_v21 = vmul.f32 %v880_v9, %v39_v17  ;;  %v40_v22 = vld [vmem:[%s1187_s0 + $0x38] sm:$0xff] }
   0x7   :  { %661 = vmatmul.mubr.msk.f32.vlgmr.msra.gmra.mxu0 %vm71_vm0, %v54_v7  ;;  %740 = vmatprep.subr.mxu1 %v356_v18 }
   0x8   :  { %663 = vmatprep.mubr.msk.f32.mxu0 %vm71_vm0, %v55_v11  ;;  %756 = vmatpush3.msra.mxu1 %v356_v18 }
   0x9   :  { %685 = vmatpush3.msra.mxu0 %v356_v18 }
   0xb   :  { %664 = vmatmul.mubr.msk.f32.gmra.mxu0 %vm71_vm0, %v56_v14 }
   0xc   :  { %666 = vmatprep.mubr.msk.f32.mxu0 %vm71_vm0, %v57_v15 }
   0xd   :  { %14 = vsyncpa [#allocation3], 0  ;;  %v41_v24 = vld [vmem:[%s1187_s0 + $0x40] sm:$0xff]  ;;  %686 = vmatprep.subr.mxu0 %v355_v19  ;;  %741 = vmatprep.subr.mxu1 %v355_v19  ;;  %v60_v26 = vmul.f32 %v889_v12, %v40_v22  ;;  %v42_v28 = vld [vmem:[%s1187_s0 + $0x48] sm:$0xff] }
   0xe   :  { %687 = vmatpush3.msra.mxu0 %v355_v19  ;;  %v353_v25 = vld [vmem:[%s1193_s6 + $0x60] sm:$0xff]  ;;  %757 = vmatpush3.msra.mxu1 %v355_v19  ;;  %v61_v27 = vmul.f32 %v862_v3, %v41_v24  ;;  %v352_v29 = vld [vmem:[%s1193_s6 + $0x58] sm:$0xff]  ;;  %v43_v30 = vld [vmem:[%s1187_s0 + $0x50] sm:$0xff]  ;;  %v62_v32 = vmul.f32 %v870_v5, %v42_v28 }
   0xf   :  { %667 = vmatmul.mubr.msk.f32.gmra.mxu0 %vm71_vm0, %v58_v20  ;;  %688 = vmatprep.subr.mxu0 %v354_v23  ;;  %v351_v31 = vld [vmem:[%s1193_s6 + $0x50] sm:$0xff]  ;;  %v63_v33 = vmul.f32 %v880_v9, %v43_v30  ;;  %v44_v34 = vld [vmem:[%s1187_s0 + $0x58] sm:$0xff]  ;;  %v350_v35 = vld [vmem:[%s1193_s6 + $0x48] sm:$0xff] }
  0x10   :  { %669 = vmatprep.mubr.msk.f32.mxu0 %vm71_vm0, %v59_v21  ;;  %689 = vmatpush3.msra.mxu0 %v354_v23  ;;  %v45_v36 = vld [vmem:[%s1187_s0 + $0x60] sm:$0xff]  ;;  %v64_v38 = vmul.f32 %v889_v12, %v44_v34  ;;  %v46_v40 = vld [vmem:[%s1187_s0 + $0x68] sm:$0xff]  ;;  %v348_v41 = vld [vmem:[%s1193_s6 + $0x38] sm:$0xff] }
  0x11   :  { %690 = vmatprep.subr.mxu0 %v353_v25  ;;  %742 = vmatprep.subr.mxu1 %v354_v23  ;;  %v349_v37 = vld [vmem:[%s1193_s6 + $0x40] sm:$0xff]  ;;  %v65_v39 = vmul.f32 %v862_v3, %v45_v36  ;;  %v47_v42 = vld [vmem:[%s1187_s0 + $0x70] sm:$0xff]  ;;  %v66_v44 = vmul.f32 %v870_v5, %v46_v40  ;;  %v48_v46 = vld [vmem:[%s1187_s0 + $0x78] sm:$0xff] }
  0x12   :  { %691 = vmatpush3.msra.mxu0 %v353_v25  ;;  %758 = vmatpush3.msra.mxu1 %v354_v23  ;;  %v347_v43 = vld [vmem:[%s1193_s6 + $0x30] sm:$0xff]  ;;  %v67_v45 = vmul.f32 %v880_v9, %v47_v42  ;;  %v68_v47 = vmul.f32 %v889_v12, %v48_v46  ;;  %v346_v48 = vld [vmem:[%s1193_s6 + $0x28] sm:$0xff]  ;;  %v345_v49 = vld [vmem:[%s1193_s6 + $0x20] sm:$0xff] }
  0x13   :  { %670 = vmatmul.mubr.msk.f32.gmra.mxu0 %vm71_vm0, %v60_v26  ;;  %692 = vmatprep.subr.mxu0 %v352_v29  ;;  %v344_v50 = vld [vmem:[%s1193_s6 + $0x18] sm:$0xff]  ;;  %v343_v51 = vld [vmem:[%s1193_s6 + $0x10] sm:$0xff]  ;;  %v342_v52 = vld [vmem:[%s1193_s6 + $0x8] sm:$0xff] }
  0x14   :  { %672 = vmatprep.mubr.msk.f32.mxu0 %vm71_vm0, %v61_v27  ;;  %693 = vmatpush3.msra.mxu0 %v352_v29  ;;  %v341_v53 = vld [vmem:[%s1193_s6] sm:$0xff]  ;;  %v1007_v54 = vld [vmem:[%s1190_s3 + $0x8] sm:$0xff]  ;;  %v1028_v61 = vld [vmem:[%s1190_s3 + $0x18] sm:$0xff] }
  0x15   :  { %694 = vmatprep.subr.mxu0 %v351_v31  ;;  %743 = vmatprep.subr.mxu1 %v353_v25  ;;  %v1012_v56 = vld [vmem:[%s1191_s4 + $0x8] sm:$0xff]  ;;  %v1017_v57 = vld [vmem:[%s1190_s3] sm:$0xff]  ;;  %v1035_v1 = vld [vmem:[%s1191_s4 + $0x18] sm:$0xff] }
  0x16   :  { %695 = vmatpush3.msra.mxu0 %v351_v31  ;;  %759 = vmatpush3.msra.mxu1 %v353_v25  ;;  %v1023_v60 = vld [vmem:[%s1191_s4] sm:$0xff]  ;;  %v1040_v2 = vld [vmem:[%s1190_s3 + $0x10] sm:$0xff]  ;;  %v1057_v9 = vld [vmem:[%s1192_s5 + $0x8] sm:$0xff] }
  0x17   :  { %673 = vmatmul.mubr.msk.f32.gmra.mxu0 %vm71_vm0, %v62_v32  ;;  %696 = vmatprep.subr.mxu0 %v350_v35  ;;  %v1047_v7 = vld [vmem:[%s1191_s4 + $0x10] sm:$0xff]  ;;  %v1052_v8 = vld [vmem:[%s1192_s5] sm:$0xff]  ;;  %v1075_v24 = vld [vmem:[%s1192_s5 + $0x18] sm:$0xff] }
  0x18   :  { %675 = vmatprep.mubr.msk.f32.mxu0 %vm71_vm0, %v63_v33  ;;  %697 = vmatpush3.msra.mxu0 %v350_v35  ;;  %v1068_v20 = vld [vmem:[%s1192_s5 + $0x10] sm:$0xff] }
  0x19   :  { %698 = vmatprep.subr.mxu0 %v349_v37  ;;  %744 = vmatprep.subr.mxu1 %v352_v29 }
  0x1a   :  { %699 = vmatpush3.msra.mxu0 %v349_v37  ;;  %760 = vmatpush3.msra.mxu1 %v352_v29 }
  0x1b   :  { %676 = vmatmul.mubr.msk.f32.gmra.mxu0 %vm71_vm0, %v64_v38  ;;  %700 = vmatprep.subr.mxu0 %v348_v41 }
  0x1c   :  { %678 = vmatprep.mubr.msk.f32.mxu0 %vm71_vm0, %v65_v39  ;;  %701 = vmatpush3.msra.mxu0 %v348_v41 }
  0x1d   :  { %702 = vmatprep.subr.mxu0 %v347_v43  ;;  %745 = vmatprep.subr.mxu1 %v351_v31 }
  0x1e   :  { %703 = vmatpush3.msra.mxu0 %v347_v43  ;;  %761 = vmatpush3.msra.mxu1 %v351_v31 }
  0x1f   :  { %679 = vmatmul.mubr.msk.f32.gmra.mxu0 %vm71_vm0, %v66_v44  ;;  %746 = vmatprep.subr.mxu1 %v350_v35 }
  0x20   :  { %681 = vmatprep.mubr.msk.f32.mxu0 %vm71_vm0, %v67_v45  ;;  %762 = vmatpush3.msra.mxu1 %v350_v35 }
  0x21   :  { %747 = vmatprep.subr.mxu1 %v349_v37  ;;  %704 = vmatprep.subr.mxu0 %v346_v48 }
  0x22   :  { %763 = vmatpush3.msra.mxu1 %v349_v37  ;;  %705 = vmatpush3.msra.mxu0 %v346_v48 }
  0x23   :  { %682 = vmatmul.mubr.msk.f32.gmra.mxu0 %vm71_vm0, %v68_v47  ;;  %748 = vmatprep.subr.mxu1 %v348_v41 }
  0x24   :  { %764 = vmatpush3.msra.mxu1 %v348_v41  ;;  %706 = vmatprep.subr.mxu0 %v345_v49 }
  0x25   :  { %749 = vmatprep.subr.mxu1 %v347_v43  ;;  %707 = vmatpush3.msra.mxu0 %v345_v49 }
  0x26   :  { %765 = vmatpush3.msra.mxu1 %v347_v43  ;;  %708 = vmatprep.subr.mxu0 %v344_v50 }
  0x27   :  { %750 = vmatprep.subr.mxu1 %v346_v48  ;;  %709 = vmatpush3.msra.mxu0 %v344_v50 }
  0x28   :  { %766 = vmatpush3.msra.mxu1 %v346_v48  ;;  %710 = vmatprep.subr.mxu0 %v343_v51 }
  0x29   :  { %751 = vmatprep.subr.mxu1 %v345_v49  ;;  %711 = vmatpush3.msra.mxu0 %v343_v51 }
  0x2a   :  { %767 = vmatpush3.msra.mxu1 %v345_v49  ;;  %712 = vmatprep.subr.mxu0 %v342_v52 }
  0x2b   :  { %752 = vmatprep.subr.mxu1 %v344_v50  ;;  %713 = vmatpush3.msra.mxu0 %v342_v52 }
  0x2c   :  { %768 = vmatpush3.msra.mxu1 %v344_v50  ;;  %714 = vmatprep.subr.mxu0 %v341_v53 }
  0x2d   :  { %753 = vmatprep.subr.mxu1 %v343_v51  ;;  %715 = vmatpush3.msra.mxu0 %v341_v53 }
  0x2e   :  { %769 = vmatpush3.msra.mxu1 %v343_v51 }
  0x2f   :  { %754 = vmatprep.subr.mxu1 %v342_v52 }
  0x30   :  { %770 = vmatpush3.msra.mxu1 %v342_v52 }
  0x31   :  { %755 = vmatprep.subr.mxu1 %v341_v53 }
  0x32   :  { %771 = vmatpush3.msra.mxu1 %v341_v53 }
  0xc7   :  { %v662_v55 = vpop.f32.mrf.mxu0 }
  0xc8   :  { %v270_v58 = vmul.f32 %v662_v55, %v1007_v54 }
  0xc9   :  { %v186_v59 = vpop.f32.mrf.mxu0 }
  0xca   :  { %v290_v62 = vadd.f32 %v1012_v56, %v270_v58  ;;  %v269_v63 = vmul.f32 %v1017_v57, %v186_v59 }
  0xcb   :  { %v665_v0 = vpop.f32.mrf.mxu0 }
  0xcc   :  { %v289_v3 = vadd.f32 %v1023_v60, %v269_v63  ;;  %v272_v4 = vmul.f32 %v665_v0, %v1028_v61  ;;  %v306_v5 = vmax.f32 %v290_v62, 0.0 }
  0xcd   :  { %v196_v6 = vpop.f32.mrf.mxu0 }
  0xce   :  { %v305_v10 = vmax.f32 %v289_v3, 0.0  ;;  %v292_v11 = vadd.f32 %v1035_v1, %v272_v4  ;;  %v271_v12 = vmul.f32 %v1040_v2, %v196_v6  ;;  %v326_v17 = vmul.f32 %v1057_v9, %v306_v5 }
  0xcf   :  { %v668_v13 = vpop.f32.mrf.mxu0 }
  0xd0   :  { %v291_v14 = vadd.f32 %v1047_v7, %v271_v12  ;;  %v274_v15 = vmul.f32 %v668_v13, %v1007_v54  ;;  %v325_v16 = vmul.f32 %v1052_v8, %v305_v10  ;;  %v308_v18 = vmax.f32 %v292_v11, 0.0 }
  0xd1   :  { %v206_v19 = vpop.f32.mrf.mxu0 }
  0xd2   :  { %v307_v21 = vmax.f32 %v291_v14, 0.0  ;;  %v294_v22 = vadd.f32 %v1012_v56, %v274_v15  ;;  %v273_v23 = vmul.f32 %v1017_v57, %v206_v19  ;;  %716 = vmatprep.mubr.f32.mxu0 %v325_v16  ;;  %v328_v31 = vmul.f32 %v1075_v24, %v308_v18 }
  0xd3   :  { %v671_v25 = vpop.f32.mrf.mxu0  ;;  %717 = vmatmul.mubr.f32.vlgmr.msra.gmra.mxu0 %v326_v17 }
  0xd4   :  { %v293_v26 = vadd.f32 %v1023_v60, %v273_v23  ;;  %v276_v27 = vmul.f32 %v671_v25, %v1028_v61  ;;  %v327_v28 = vmul.f32 %v1068_v20, %v307_v21  ;;  %v310_v29 = vmax.f32 %v294_v22, 0.0  ;;  %v1136_v25 = vld [vmem:[%s1194_s7 + $0x18] sm:$0xff] }
  0xd5   :  { %v216_v30 = vpop.f32.mrf.mxu0 }
  0xd6   :  { %v309_v32 = vmax.f32 %v293_v26, 0.0  ;;  %v296_v33 = vadd.f32 %v1035_v1, %v276_v27  ;;  %v275_v34 = vmul.f32 %v1040_v2, %v216_v30  ;;  %719 = vmatprep.mubr.f32.mxu0 %v327_v28  ;;  %v330_v41 = vmul.f32 %v1057_v9, %v310_v29  ;;  %v1143_v29 = vld [vmem:[%s1195_s8 + $0x18] sm:$0xff]  ;;  %v1148_v30 = vld [vmem:[%s1194_s7 + $0x10] sm:$0xff] }
  0xd7   :  { %v674_v35 = vpop.f32.mrf.mxu0  ;;  %720 = vmatmul.mubr.f32.gmra.mxu0 %v328_v31 }
  0xd8   :  { %v278_v36 = vmul.f32 %v674_v35, %v1007_v54  ;;  %v329_v37 = vmul.f32 %v1052_v8, %v309_v32  ;;  %v295_v38 = vadd.f32 %v1047_v7, %v275_v34  ;;  %v312_v39 = vmax.f32 %v296_v33, 0.0  ;;  %v1155_v35 = vld [vmem:[%s1195_s8 + $0x10] sm:$0xff] }
  0xd9   :  { %v226_v40 = vpop.f32.mrf.mxu0 }
  0xda   :  { %v298_v42 = vadd.f32 %v1012_v56, %v278_v36  ;;  %v277_v43 = vmul.f32 %v1017_v57, %v226_v40  ;;  %722 = vmatprep.mubr.f32.mxu0 %v329_v37  ;;  %v311_v44 = vmax.f32 %v295_v38, 0.0  ;;  %v332_v51 = vmul.f32 %v1075_v24, %v312_v39 }
  0xdb   :  { %v677_v45 = vpop.f32.mrf.mxu0  ;;  %723 = vmatmul.mubr.f32.gmra.mxu0 %v330_v41 }
  0xdc   :  { %v297_v46 = vadd.f32 %v1023_v60, %v277_v43  ;;  %v280_v47 = vmul.f32 %v677_v45, %v1028_v61  ;;  %v331_v48 = vmul.f32 %v1068_v20, %v311_v44  ;;  %v314_v49 = vmax.f32 %v298_v42, 0.0 }
  0xdd   :  { %v236_v50 = vpop.f32.mrf.mxu0 }
  0xde   :  { %v313_v52 = vmax.f32 %v297_v46, 0.0  ;;  %v300_v53 = vadd.f32 %v1035_v1, %v280_v47  ;;  %v279_v55 = vmul.f32 %v1040_v2, %v236_v50  ;;  %725 = vmatprep.mubr.f32.mxu1 %v331_v48  ;;  %v334_v4 = vmul.f32 %v1057_v9, %v314_v49 }
  0xdf   :  { %v680_v58 = vpop.f32.mrf.mxu0  ;;  %726 = vmatmul.mubr.f32.vlgmr.msra.gmra.mxu1 %v332_v51 }
  0xe0   :  { %v299_v59 = vadd.f32 %v1047_v7, %v279_v55  ;;  %v282_v62 = vmul.f32 %v680_v58, %v1007_v54  ;;  %v333_v63 = vmul.f32 %v1052_v8, %v313_v52  ;;  %v316_v0 = vmax.f32 %v300_v53, 0.0 }
  0xe1   :  { %v246_v3 = vpop.f32.mrf.mxu0 }
  0xe2   :  { %v315_v5 = vmax.f32 %v299_v59, 0.0  ;;  %v302_v6 = vadd.f32 %v1012_v56, %v282_v62  ;;  %v281_v10 = vmul.f32 %v1017_v57, %v246_v3  ;;  %728 = vmatprep.mubr.f32.mxu1 %v333_v63  ;;  %v336_v16 = vmul.f32 %v1075_v24, %v316_v0 }
  0xe3   :  { %v683_v11 = vpop.f32.mrf.mxu0  ;;  %729 = vmatmul.mubr.f32.gmra.mxu1 %v334_v4 }
  0xe4   :  { %v301_v12 = vadd.f32 %v1023_v60, %v281_v10  ;;  %v284_v13 = vmul.f32 %v683_v11, %v1028_v61  ;;  %v335_v54 = vmul.f32 %v1068_v20, %v315_v5  ;;  %v318_v14 = vmax.f32 %v302_v6, 0.0 }
  0xe5   :  { %v256_v15 = vpop.f32.mrf.mxu0 }
  0xe6   :  { %v317_v17 = vmax.f32 %v301_v12, 0.0  ;;  %v304_v18 = vadd.f32 %v1035_v1, %v284_v13  ;;  %v283_v56 = vmul.f32 %v1040_v2, %v256_v15  ;;  %731 = vmatprep.mubr.f32.mxu1 %v335_v54  ;;  %v338_v61 = vmul.f32 %v1057_v9, %v318_v14  ;;  %v1115_v1 = vld [vmem:[%s1194_s7 + $0x8] sm:$0xff] }
  0xe7   :  { %732 = vmatmul.mubr.f32.gmra.mxu1 %v336_v16 }
  0xe8   :  { %v303_v57 = vadd.f32 %v1047_v7, %v283_v56  ;;  %v337_v19 = vmul.f32 %v1052_v8, %v317_v17  ;;  %v320_v60 = vmax.f32 %v304_v18, 0.0  ;;  %v1120_v7 = vld [vmem:[%s1195_s8 + $0x8] sm:$0xff]  ;;  %v1125_v8 = vld [vmem:[%s1194_s7] sm:$0xff]  ;;  %s797_s7 = smov [#allocation2]  }
  0xea   :  { %v319_v21 = vmax.f32 %v303_v57, 0.0  ;;  %734 = vmatprep.mubr.f32.mxu1 %v337_v19  ;;  %v340_v23 = vmul.f32 %v1075_v24, %v320_v60  ;;  %v1131_v24 = vld [vmem:[%s1195_s8] sm:$0xff]  ;;  %s579_s8 = sshll.u32 %s797_s7, 4  ;;  %s580_s8 = int_to_ptr.vmem [resolvable:$true] %s579_s8 }
  0xeb   :  { %735 = vmatmul.mubr.f32.gmra.mxu1 %v338_v61  ;;  %s775_s25 = scalar_lea.vmem %s580_s8, 2048  ;;  %p780_p1 = scmp.lt.s32.totalorder %s580_s8, %s580_s8 }
  0xec   :  { %v339_v22 = vmul.f32 %v1068_v20, %v319_v21  ;;  %p776_p0 = scmp.ne.s32.totalorder %s580_s8, %s775_s25  ;;  %p781_p2 = scmp.lt.s32.totalorder %s775_s25, %s775_s25 }
  0xee   :  { %737 = vmatprep.mubr.f32.mxu1 %v339_v22  ;;  %p782_p3 = por %p781_p2, %p780_p1 }
  0xef   :  { %738 = vmatmul.mubr.f32.gmra.mxu1 %v340_v23 }
  0xf0   :  { %p783_p4 = pnand %p782_p3, %p776_p0 }
 0x193   :  { %v718_v2 = vpop.f32.mrf.mxu0 }
 0x194   :  { %v507_v9 = vmul.f32 %v718_v2, %v1115_v1 }
 0x195   :  { %v423_v20 = vpop.f32.mrf.mxu0 }
 0x196   :  { %v527_v26 = vadd.f32 %v1120_v7, %v507_v9  ;;  %v506_v27 = vmul.f32 %v1125_v8, %v423_v20 }
 0x197   :  { %v721_v28 = vpop.f32.mrf.mxu0 }
 0x198   :  { %v543_v31 = vmax.f32 %v527_v26, 0.0  ;;  %v526_v32 = vadd.f32 %v1131_v24, %v506_v27  ;;  %v509_v33 = vmul.f32 %v721_v28, %v1136_v25 }
 0x199   :  { %v433_v34 = vpop.f32.mrf.mxu0 }
 0x19a   :  { %559 = vst [vmem:[#allocation2 + $0x8] sm:$0xff] %v543_v31  ;;  %v542_v36 = vmax.f32 %v526_v32, 0.0  ;;  %v529_v37 = vadd.f32 %v1143_v29, %v509_v33  ;;  %v508_v38 = vmul.f32 %v1148_v30, %v433_v34 }
 0x19b   :  { %v724_v39 = vpop.f32.mrf.mxu0 }
 0x19c   :  { %558 = vst [vmem:[#allocation2] sm:$0xff] %v542_v36  ;;  %v545_v40 = vmax.f32 %v529_v37, 0.0  ;;  %v528_v41 = vadd.f32 %v1155_v35, %v508_v38  ;;  %v511_v42 = vmul.f32 %v724_v39, %v1115_v1 }
 0x19d   :  { %v443_v43 = vpop.f32.mrf.mxu0 }
 0x19e   :  { %561 = vst [vmem:[#allocation2 + $0x18] sm:$0xff] %v545_v40  ;;  %v544_v44 = vmax.f32 %v528_v41, 0.0  ;;  %v531_v45 = vadd.f32 %v1120_v7, %v511_v42  ;;  %v510_v46 = vmul.f32 %v1125_v8, %v443_v43 }
 0x19f   :  { %v727_v47 = vpop.f32.mrf.mxu1 }
 0x1a0   :  { %560 = vst [vmem:[#allocation2 + $0x10] sm:$0xff] %v544_v44  ;;  %v547_v48 = vmax.f32 %v531_v45, 0.0  ;;  %v530_v49 = vadd.f32 %v1131_v24, %v510_v46  ;;  %v513_v50 = vmul.f32 %v727_v47, %v1136_v25 }
 0x1a1   :  { %v453_v51 = vpop.f32.mrf.mxu1 }
 0x1a2   :  { %563 = vst [vmem:[#allocation2 + $0x28] sm:$0xff] %v547_v48  ;;  %v546_v52 = vmax.f32 %v530_v49, 0.0  ;;  %v533_v53 = vadd.f32 %v1143_v29, %v513_v50  ;;  %v512_v55 = vmul.f32 %v1148_v30, %v453_v51 }
 0x1a3   :  { %v730_v58 = vpop.f32.mrf.mxu1 }
 0x1a4   :  { %562 = vst [vmem:[#allocation2 + $0x20] sm:$0xff] %v546_v52  ;;  %v549_v59 = vmax.f32 %v533_v53, 0.0  ;;  %v532_v62 = vadd.f32 %v1155_v35, %v512_v55  ;;  %v515_v63 = vmul.f32 %v730_v58, %v1115_v1 }
 0x1a5   :  { %v463_v0 = vpop.f32.mrf.mxu1 }
 0x1a6   :  { %565 = vst [vmem:[#allocation2 + $0x38] sm:$0xff] %v549_v59  ;;  %v548_v3 = vmax.f32 %v532_v62, 0.0  ;;  %v535_v4 = vadd.f32 %v1120_v7, %v515_v63  ;;  %v514_v5 = vmul.f32 %v1125_v8, %v463_v0 }
 0x1a7   :  { %v733_v6 = vpop.f32.mrf.mxu1 }
 0x1a8   :  { %564 = vst [vmem:[#allocation2 + $0x30] sm:$0xff] %v548_v3  ;;  %v551_v10 = vmax.f32 %v535_v4, 0.0  ;;  %v534_v11 = vadd.f32 %v1131_v24, %v514_v5  ;;  %v517_v12 = vmul.f32 %v733_v6, %v1136_v25 }
 0x1a9   :  { %v473_v13 = vpop.f32.mrf.mxu1 }
 0x1aa   :  { %567 = vst [vmem:[#allocation2 + $0x48] sm:$0xff] %v551_v10  ;;  %v550_v54 = vmax.f32 %v534_v11, 0.0  ;;  %v537_v14 = vadd.f32 %v1143_v29, %v517_v12  ;;  %v516_v15 = vmul.f32 %v1148_v30, %v473_v13 }
 0x1ab   :  { %v736_v16 = vpop.f32.mrf.mxu1 }
 0x1ac   :  { %566 = vst [vmem:[#allocation2 + $0x40] sm:$0xff] %v550_v54  ;;  %v553_v17 = vmax.f32 %v537_v14, 0.0  ;;  %v536_v18 = vadd.f32 %v1155_v35, %v516_v15  ;;  %v519_v56 = vmul.f32 %v736_v16, %v1115_v1 }
 0x1ad   :  { %v483_v57 = vpop.f32.mrf.mxu1 }
 0x1ae   :  { %569 = vst [vmem:[#allocation2 + $0x58] sm:$0xff] %v553_v17  ;;  %v552_v19 = vmax.f32 %v536_v18, 0.0  ;;  %v539_v60 = vadd.f32 %v1120_v7, %v519_v56  ;;  %v518_v61 = vmul.f32 %v1125_v8, %v483_v57 }
 0x1af   :  { %v739_v21 = vpop.f32.mrf.mxu1 }
 0x1b0   :  { %568 = vst [vmem:[#allocation2 + $0x50] sm:$0xff] %v552_v19  ;;  %v555_v22 = vmax.f32 %v539_v60, 0.0  ;;  %v538_v23 = vadd.f32 %v1131_v24, %v518_v61  ;;  %v521_v2 = vmul.f32 %v739_v21, %v1136_v25 }
 0x1b1   :  { %v493_v9 = vpop.f32.mrf.mxu1 }
 0x1b2   :  { %571 = vst [vmem:[#allocation2 + $0x68] sm:$0xff] %v555_v22  ;;  %v554_v20 = vmax.f32 %v538_v23, 0.0  ;;  %v541_v26 = vadd.f32 %v1143_v29, %v521_v2  ;;  %v520_v1 = vmul.f32 %v1148_v30, %v493_v9 }
 0x1b4   :  { %570 = vst [vmem:[#allocation2 + $0x60] sm:$0xff] %v554_v20  ;;  %v557_v7 = vmax.f32 %v541_v26, 0.0  ;;  %v540_v8 = vadd.f32 %v1155_v35, %v520_v1 }
 0x1b6   :  { %573 = vst [vmem:[#allocation2 + $0x78] sm:$0xff] %v557_v7  ;;  %v556_v27 = vmax.f32 %v540_v8, 0.0 }
 0x1b8   :  { %572 = vst [vmem:[#allocation2 + $0x70] sm:$0xff] %v556_v27 }
 0x1b9   :  { %786 = shalt.err (!%p783_p4)
}
 0x1ba   :  { %s798_s0 = smov 128   ;;  %s799_s26 = smov 8  }
 0x1bb   :  { %585 = dma.vmem_to_hbm [thread:$0]  %s580_s8, 2048, %s1196_s9, [#allocation3], %s798_s0, %s798_s0, %s799_s26  }
 0x1bc   :  { %795 = dma.done.wait [#allocation3], 2048  }
 0x1bd   :  { %796 = vsyncadd [#allocation3], 4294965248 }
 0x1be   :  { %589 = vsyncpa [#allocation3], 1 }

// kernel: tabm_apply.1
= control target key start
LH: loop header
LB: loop body
LE: loop exit
PB: predicated region body
PF: predicated region fallthrough
CT: control target
= control target key end

     0   :  { %vm71_vm0 = vcmask 130048   ;;  %s1187_s0 = inlined_call_operand.vmem [shape: f32[4,32,16], index: 0, kind: input, shape index: {}]   ;;  %s1188_s1 = inlined_call_operand.vmem [shape: f32[32,16], index: 1, kind: input, shape index: {}]   ;;  %s1189_s2 = inlined_call_operand.vmem [shape: f32[16,128], index: 2, kind: input, shape index: {}]   ;;  %s1190_s3 = inlined_call_operand.vmem [shape: f32[32,128], index: 3, kind: input, shape index: {}]   ;;  %s1191_s4 = inlined_call_operand.vmem [shape: f32[32,128], index: 4, kind: input, shape index: {}]   ;;  %s1192_s5 = inlined_call_operand.vmem [shape: f32[32,128], index: 5, kind: input, shape index: {}]   ;;  %s1193_s6 = inlined_call_operand.vmem [shape: f32[128,128], index: 6, kind: input, shape index: {}]   ;;  %s1194_s7 = inlined_call_operand.vmem [shape: f32[32,128], index: 7, kind: input, shape index: {}]   ;;  %s1195_s8 = inlined_call_operand.vmem [shape: f32[32,128], index: 8, kind: input, shape index: {}]   ;;  %s1196_s9 = inlined_call_operand.hbm [shape: f32[4,32,128], index: 9, kind: output, shape index: {}]  }
   0x1   :  { %v70_v0 = vld [vmem:[%s1189_s2 + $0x8] sm:$0xff]  ;;  %v69_v1 = vld [vmem:[%s1189_s2] sm:$0xff]  ;;  %v35_v8 = vld [vmem:[%s1187_s0 + $0x10] sm:$0xff] }
   0x2   :  { %v33_v2 = vld [vmem:[%s1187_s0] sm:$0xff]  ;;  %656 = vmatprep.subr.mxu0 %v70_v0  ;;  %v34_v4 = vld [vmem:[%s1187_s0 + $0x8] sm:$0xff]  ;;  %v880_v9 = vld [vmem:[%s1188_s1 + $0x10] sm:$0xff] }
   0x3   :  { %v862_v3 = vld [vmem:[%s1188_s1] sm:$0xff]  ;;  %v870_v5 = vld [vmem:[%s1188_s1 + $0x8] sm:$0xff]  ;;  %657 = vmatpush3.msra.mxu0 %v70_v0  ;;  %v36_v10 = vld [vmem:[%s1187_s0 + $0x18] sm:$0xff]  ;;  %v55_v11 = vmul.f32 %v880_v9, %v35_v8 }
   0x4   :  { %v53_v6 = vmul.f32 %v862_v3, %v33_v2  ;;  %v54_v7 = vmul.f32 %v870_v5, %v34_v4  ;;  %658 = vmatprep.subr.mxu0 %v69_v1  ;;  %v889_v12 = vld [vmem:[%s1188_s1 + $0x18] sm:$0xff]  ;;  %v37_v13 = vld [vmem:[%s1187_s0 + $0x20] sm:$0xff]  ;;  %v38_v16 = vld [vmem:[%s1187_s0 + $0x28] sm:$0xff] }
   0x5   :  { %659 = vmatpush3.msra.mxu0 %v69_v1  ;;  %v56_v14 = vmul.f32 %v889_v12, %v36_v10  ;;  %v57_v15 = vmul.f32 %v862_v3, %v37_v13  ;;  %v39_v17 = vld [vmem:[%s1187_s0 + $0x30] sm:$0xff]  ;;  %v356_v18 = vld [vmem:[%s1193_s6 + $0x78] sm:$0xff]  ;;  %v58_v20 = vmul.f32 %v870_v5, %v38_v16  ;;  %v354_v23 = vld [vmem:[%s1193_s6 + $0x68] sm:$0xff] }
   0x6   :  { %660 = vmatprep.mubr.msk.f32.mxu0 %vm71_vm0, %v53_v6  ;;  %684 = vmatprep.subr.mxu0 %v356_v18  ;;  %v355_v19 = vld [vmem:[%s1193_s6 + $0x70] sm:$0xff]  ;;  %v59_v21 = vmul.f32 %v880_v9, %v39_v17  ;;  %v40_v22 = vld [vmem:[%s1187_s0 + $0x38] sm:$0xff] }
   0x7   :  { %661 = vmatmul.mubr.msk.f32.vlgmr.msra.gmra.mxu0 %vm71_vm0, %v54_v7  ;;  %740 = vmatprep.subr.mxu1 %v356_v18 }
   0x8   :  { %663 = vmatprep.mubr.msk.f32.mxu0 %vm71_vm0, %v55_v11  ;;  %756 = vmatpush3.msra.mxu1 %v356_v18 }
   0x9   :  { %685 = vmatpush3.msra.mxu0 %v356_v18 }
   0xb   :  { %664 = vmatmul.mubr.msk.f32.gmra.mxu0 %vm71_vm0, %v56_v14 }
   0xc   :  { %666 = vmatprep.mubr.msk.f32.mxu0 %vm71_vm0, %v57_v15 }
   0xd   :  { %14 = vsyncpa [#allocation3], 0  ;;  %v41_v24 = vld [vmem:[%s1187_s0 + $0x40] sm:$0xff]  ;;  %686 = vmatprep.subr.mxu0 %v355_v19  ;;  %741 = vmatprep.subr.mxu1 %v355_v19  ;;  %v60_v26 = vmul.f32 %v889_v12, %v40_v22  ;;  %v42_v28 = vld [vmem:[%s1187_s0 + $0x48] sm:$0xff] }
   0xe   :  { %687 = vmatpush3.msra.mxu0 %v355_v19  ;;  %v353_v25 = vld [vmem:[%s1193_s6 + $0x60] sm:$0xff]  ;;  %757 = vmatpush3.msra.mxu1 %v355_v19  ;;  %v61_v27 = vmul.f32 %v862_v3, %v41_v24  ;;  %v352_v29 = vld [vmem:[%s1193_s6 + $0x58] sm:$0xff]  ;;  %v43_v30 = vld [vmem:[%s1187_s0 + $0x50] sm:$0xff]  ;;  %v62_v32 = vmul.f32 %v870_v5, %v42_v28 }
   0xf   :  { %667 = vmatmul.mubr.msk.f32.gmra.mxu0 %vm71_vm0, %v58_v20  ;;  %688 = vmatprep.subr.mxu0 %v354_v23  ;;  %v351_v31 = vld [vmem:[%s1193_s6 + $0x50] sm:$0xff]  ;;  %v63_v33 = vmul.f32 %v880_v9, %v43_v30  ;;  %v44_v34 = vld [vmem:[%s1187_s0 + $0x58] sm:$0xff]  ;;  %v350_v35 = vld [vmem:[%s1193_s6 + $0x48] sm:$0xff] }
  0x10   :  { %669 = vmatprep.mubr.msk.f32.mxu0 %vm71_vm0, %v59_v21  ;;  %689 = vmatpush3.msra.mxu0 %v354_v23  ;;  %v45_v36 = vld [vmem:[%s1187_s0 + $0x60] sm:$0xff]  ;;  %v64_v38 = vmul.f32 %v889_v12, %v44_v34  ;;  %v46_v40 = vld [vmem:[%s1187_s0 + $0x68] sm:$0xff]  ;;  %v348_v41 = vld [vmem:[%s1193_s6 + $0x38] sm:$0xff] }
  0x11   :  { %690 = vmatprep.subr.mxu0 %v353_v25  ;;  %742 = vmatprep.subr.mxu1 %v354_v23  ;;  %v349_v37 = vld [vmem:[%s1193_s6 + $0x40] sm:$0xff]  ;;  %v65_v39 = vmul.f32 %v862_v3, %v45_v36  ;;  %v47_v42 = vld [vmem:[%s1187_s0 + $0x70] sm:$0xff]  ;;  %v66_v44 = vmul.f32 %v870_v5, %v46_v40  ;;  %v48_v46 = vld [vmem:[%s1187_s0 + $0x78] sm:$0xff] }
  0x12   :  { %691 = vmatpush3.msra.mxu0 %v353_v25  ;;  %758 = vmatpush3.msra.mxu1 %v354_v23  ;;  %v347_v43 = vld [vmem:[%s1193_s6 + $0x30] sm:$0xff]  ;;  %v67_v45 = vmul.f32 %v880_v9, %v47_v42  ;;  %v68_v47 = vmul.f32 %v889_v12, %v48_v46  ;;  %v346_v48 = vld [vmem:[%s1193_s6 + $0x28] sm:$0xff]  ;;  %v345_v49 = vld [vmem:[%s1193_s6 + $0x20] sm:$0xff] }
  0x13   :  { %670 = vmatmul.mubr.msk.f32.gmra.mxu0 %vm71_vm0, %v60_v26  ;;  %692 = vmatprep.subr.mxu0 %v352_v29  ;;  %v344_v50 = vld [vmem:[%s1193_s6 + $0x18] sm:$0xff]  ;;  %v343_v51 = vld [vmem:[%s1193_s6 + $0x10] sm:$0xff]  ;;  %v342_v52 = vld [vmem:[%s1193_s6 + $0x8] sm:$0xff] }
  0x14   :  { %672 = vmatprep.mubr.msk.f32.mxu0 %vm71_vm0, %v61_v27  ;;  %693 = vmatpush3.msra.mxu0 %v352_v29  ;;  %v341_v53 = vld [vmem:[%s1193_s6] sm:$0xff]  ;;  %v1007_v54 = vld [vmem:[%s1190_s3 + $0x8] sm:$0xff]  ;;  %v1028_v61 = vld [vmem:[%s1190_s3 + $0x18] sm:$0xff] }
  0x15   :  { %694 = vmatprep.subr.mxu0 %v351_v31  ;;  %743 = vmatprep.subr.mxu1 %v353_v25  ;;  %v1012_v56 = vld [vmem:[%s1191_s4 + $0x8] sm:$0xff]  ;;  %v1017_v57 = vld [vmem:[%s1190_s3] sm:$0xff]  ;;  %v1035_v1 = vld [vmem:[%s1191_s4 + $0x18] sm:$0xff] }
  0x16   :  { %695 = vmatpush3.msra.mxu0 %v351_v31  ;;  %759 = vmatpush3.msra.mxu1 %v353_v25  ;;  %v1023_v60 = vld [vmem:[%s1191_s4] sm:$0xff]  ;;  %v1040_v2 = vld [vmem:[%s1190_s3 + $0x10] sm:$0xff]  ;;  %v1057_v9 = vld [vmem:[%s1192_s5 + $0x8] sm:$0xff] }
  0x17   :  { %673 = vmatmul.mubr.msk.f32.gmra.mxu0 %vm71_vm0, %v62_v32  ;;  %696 = vmatprep.subr.mxu0 %v350_v35  ;;  %v1047_v7 = vld [vmem:[%s1191_s4 + $0x10] sm:$0xff]  ;;  %v1052_v8 = vld [vmem:[%s1192_s5] sm:$0xff]  ;;  %v1075_v24 = vld [vmem:[%s1192_s5 + $0x18] sm:$0xff] }
  0x18   :  { %675 = vmatprep.mubr.msk.f32.mxu0 %vm71_vm0, %v63_v33  ;;  %697 = vmatpush3.msra.mxu0 %v350_v35  ;;  %v1068_v20 = vld [vmem:[%s1192_s5 + $0x10] sm:$0xff] }
  0x19   :  { %698 = vmatprep.subr.mxu0 %v349_v37  ;;  %744 = vmatprep.subr.mxu1 %v352_v29 }
  0x1a   :  { %699 = vmatpush3.msra.mxu0 %v349_v37  ;;  %760 = vmatpush3.msra.mxu1 %v352_v29 }
  0x1b   :  { %676 = vmatmul.mubr.msk.f32.gmra.mxu0 %vm71_vm0, %v64_v38  ;;  %700 = vmatprep.subr.mxu0 %v348_v41 }
  0x1c   :  { %678 = vmatprep.mubr.msk.f32.mxu0 %vm71_vm0, %v65_v39  ;;  %701 = vmatpush3.msra.mxu0 %v348_v41 }
  0x1d   :  { %702 = vmatprep.subr.mxu0 %v347_v43  ;;  %745 = vmatprep.subr.mxu1 %v351_v31 }
  0x1e   :  { %703 = vmatpush3.msra.mxu0 %v347_v43  ;;  %761 = vmatpush3.msra.mxu1 %v351_v31 }
  0x1f   :  { %679 = vmatmul.mubr.msk.f32.gmra.mxu0 %vm71_vm0, %v66_v44  ;;  %746 = vmatprep.subr.mxu1 %v350_v35 }
  0x20   :  { %681 = vmatprep.mubr.msk.f32.mxu0 %vm71_vm0, %v67_v45  ;;  %762 = vmatpush3.msra.mxu1 %v350_v35 }
  0x21   :  { %747 = vmatprep.subr.mxu1 %v349_v37  ;;  %704 = vmatprep.subr.mxu0 %v346_v48 }
  0x22   :  { %763 = vmatpush3.msra.mxu1 %v349_v37  ;;  %705 = vmatpush3.msra.mxu0 %v346_v48 }
  0x23   :  { %682 = vmatmul.mubr.msk.f32.gmra.mxu0 %vm71_vm0, %v68_v47  ;;  %748 = vmatprep.subr.mxu1 %v348_v41 }
  0x24   :  { %764 = vmatpush3.msra.mxu1 %v348_v41  ;;  %706 = vmatprep.subr.mxu0 %v345_v49 }
  0x25   :  { %749 = vmatprep.subr.mxu1 %v347_v43  ;;  %707 = vmatpush3.msra.mxu0 %v345_v49 }
  0x26   :  { %765 = vmatpush3.msra.mxu1 %v347_v43  ;;  %708 = vmatprep.subr.mxu0 %v344_v50 }
  0x27   :  { %750 = vmatprep.subr.mxu1 %v346_v48  ;;  %709 = vmatpush3.msra.mxu0 %v344_v50 }
  0x28   :  { %766 = vmatpush3.msra.mxu1 %v346_v48  ;;  %710 = vmatprep.subr.mxu0 %v343_v51 }
  0x29   :  { %751 = vmatprep.subr.mxu1 %v345_v49  ;;  %711 = vmatpush3.msra.mxu0 %v343_v51 }
  0x2a   :  { %767 = vmatpush3.msra.mxu1 %v345_v49  ;;  %712 = vmatprep.subr.mxu0 %v342_v52 }
  0x2b   :  { %752 = vmatprep.subr.mxu1 %v344_v50  ;;  %713 = vmatpush3.msra.mxu0 %v342_v52 }
  0x2c   :  { %768 = vmatpush3.msra.mxu1 %v344_v50  ;;  %714 = vmatprep.subr.mxu0 %v341_v53 }
  0x2d   :  { %753 = vmatprep.subr.mxu1 %v343_v51  ;;  %715 = vmatpush3.msra.mxu0 %v341_v53 }
  0x2e   :  { %769 = vmatpush3.msra.mxu1 %v343_v51 }
  0x2f   :  { %754 = vmatprep.subr.mxu1 %v342_v52 }
  0x30   :  { %770 = vmatpush3.msra.mxu1 %v342_v52 }
  0x31   :  { %755 = vmatprep.subr.mxu1 %v341_v53 }
  0x32   :  { %771 = vmatpush3.msra.mxu1 %v341_v53 }
  0xc7   :  { %v662_v55 = vpop.f32.mrf.mxu0 }
  0xc8   :  { %v270_v58 = vmul.f32 %v662_v55, %v1007_v54 }
  0xc9   :  { %v186_v59 = vpop.f32.mrf.mxu0 }
  0xca   :  { %v290_v62 = vadd.f32 %v1012_v56, %v270_v58  ;;  %v269_v63 = vmul.f32 %v1017_v57, %v186_v59 }
  0xcb   :  { %v665_v0 = vpop.f32.mrf.mxu0 }
  0xcc   :  { %v289_v3 = vadd.f32 %v1023_v60, %v269_v63  ;;  %v272_v4 = vmul.f32 %v665_v0, %v1028_v61  ;;  %v306_v5 = vmax.f32 %v290_v62, 0.0 }
  0xcd   :  { %v196_v6 = vpop.f32.mrf.mxu0 }
  0xce   :  { %v305_v10 = vmax.f32 %v289_v3, 0.0  ;;  %v292_v11 = vadd.f32 %v1035_v1, %v272_v4  ;;  %v271_v12 = vmul.f32 %v1040_v2, %v196_v6  ;;  %v326_v17 = vmul.f32 %v1057_v9, %v306_v5 }
  0xcf   :  { %v668_v13 = vpop.f32.mrf.mxu0 }
  0xd0   :  { %v291_v14 = vadd.f32 %v1047_v7, %v271_v12  ;;  %v274_v15 = vmul.f32 %v668_v13, %v1007_v54  ;;  %v325_v16 = vmul.f32 %v1052_v8, %v305_v10  ;;  %v308_v18 = vmax.f32 %v292_v11, 0.0 }
  0xd1   :  { %v206_v19 = vpop.f32.mrf.mxu0 }
  0xd2   :  { %v307_v21 = vmax.f32 %v291_v14, 0.0  ;;  %v294_v22 = vadd.f32 %v1012_v56, %v274_v15  ;;  %v273_v23 = vmul.f32 %v1017_v57, %v206_v19  ;;  %716 = vmatprep.mubr.f32.mxu0 %v325_v16  ;;  %v328_v31 = vmul.f32 %v1075_v24, %v308_v18 }
  0xd3   :  { %v671_v25 = vpop.f32.mrf.mxu0  ;;  %717 = vmatmul.mubr.f32.vlgmr.msra.gmra.mxu0 %v326_v17 }
  0xd4   :  { %v293_v26 = vadd.f32 %v1023_v60, %v273_v23  ;;  %v276_v27 = vmul.f32 %v671_v25, %v1028_v61  ;;  %v327_v28 = vmul.f32 %v1068_v20, %v307_v21  ;;  %v310_v29 = vmax.f32 %v294_v22, 0.0  ;;  %v1136_v25 = vld [vmem:[%s1194_s7 + $0x18] sm:$0xff] }
  0xd5   :  { %v216_v30 = vpop.f32.mrf.mxu0 }
  0xd6   :  { %v309_v32 = vmax.f32 %v293_v26, 0.0  ;;  %v296_v33 = vadd.f32 %v1035_v1, %v276_v27  ;;  %v275_v34 = vmul.f32 %v1040_v2, %v216_v30  ;;  %719 = vmatprep.mubr.f32.mxu0 %v327_v28  ;;  %v330_v41 = vmul.f32 %v1057_v9, %v310_v29  ;;  %v1143_v29 = vld [vmem:[%s1195_s8 + $0x18] sm:$0xff]  ;;  %v1148_v30 = vld [vmem:[%s1194_s7 + $0x10] sm:$0xff] }
  0xd7   :  { %v674_v35 = vpop.f32.mrf.mxu0  ;;  %720 = vmatmul.mubr.f32.gmra.mxu0 %v328_v31 }
  0xd8   :  { %v278_v36 = vmul.f32 %v674_v35, %v1007_v54  ;;  %v329_v37 = vmul.f32 %v1052_v8, %v309_v32  ;;  %v295_v38 = vadd.f32 %v1047_v7, %v275_v34  ;;  %v312_v39 = vmax.f32 %v296_v33, 0.0  ;;  %v1155_v35 = vld [vmem:[%s1195_s8 + $0x10] sm:$0xff] }
  0xd9   :  { %v226_v40 = vpop.f32.mrf.mxu0 }
  0xda   :  { %v298_v42 = vadd.f32 %v1012_v56, %v278_v36  ;;  %v277_v43 = vmul.f32 %v1017_v57, %v226_v40  ;;  %722 = vmatprep.mubr.f32.mxu0 %v329_v37  ;;  %v311_v44 = vmax.f32 %v295_v38, 0.0  ;;  %v332_v51 = vmul.f32 %v1075_v24, %v312_v39 }
  0xdb   :  { %v677_v45 = vpop.f32.mrf.mxu0  ;;  %723 = vmatmul.mubr.f32.gmra.mxu0 %v330_v41 }
  0xdc   :  { %v297_v46 = vadd.f32 %v1023_v60, %v277_v43  ;;  %v280_v47 = vmul.f32 %v677_v45, %v1028_v61  ;;  %v331_v48 = vmul.f32 %v1068_v20, %v311_v44  ;;  %v314_v49 = vmax.f32 %v298_v42, 0.0 }
  0xdd   :  { %v236_v50 = vpop.f32.mrf.mxu0 }
  0xde   :  { %v313_v52 = vmax.f32 %v297_v46, 0.0  ;;  %v300_v53 = vadd.f32 %v1035_v1, %v280_v47  ;;  %v279_v55 = vmul.f32 %v1040_v2, %v236_v50  ;;  %725 = vmatprep.mubr.f32.mxu1 %v331_v48  ;;  %v334_v4 = vmul.f32 %v1057_v9, %v314_v49 }
  0xdf   :  { %v680_v58 = vpop.f32.mrf.mxu0  ;;  %726 = vmatmul.mubr.f32.vlgmr.msra.gmra.mxu1 %v332_v51 }
  0xe0   :  { %v299_v59 = vadd.f32 %v1047_v7, %v279_v55  ;;  %v282_v62 = vmul.f32 %v680_v58, %v1007_v54  ;;  %v333_v63 = vmul.f32 %v1052_v8, %v313_v52  ;;  %v316_v0 = vmax.f32 %v300_v53, 0.0 }
  0xe1   :  { %v246_v3 = vpop.f32.mrf.mxu0 }
  0xe2   :  { %v315_v5 = vmax.f32 %v299_v59, 0.0  ;;  %v302_v6 = vadd.f32 %v1012_v56, %v282_v62  ;;  %v281_v10 = vmul.f32 %v1017_v57, %v246_v3  ;;  %728 = vmatprep.mubr.f32.mxu1 %v333_v63  ;;  %v336_v16 = vmul.f32 %v1075_v24, %v316_v0 }
  0xe3   :  { %v683_v11 = vpop.f32.mrf.mxu0  ;;  %729 = vmatmul.mubr.f32.gmra.mxu1 %v334_v4 }
  0xe4   :  { %v301_v12 = vadd.f32 %v1023_v60, %v281_v10  ;;  %v284_v13 = vmul.f32 %v683_v11, %v1028_v61  ;;  %v335_v54 = vmul.f32 %v1068_v20, %v315_v5  ;;  %v318_v14 = vmax.f32 %v302_v6, 0.0 }
  0xe5   :  { %v256_v15 = vpop.f32.mrf.mxu0 }
  0xe6   :  { %v317_v17 = vmax.f32 %v301_v12, 0.0  ;;  %v304_v18 = vadd.f32 %v1035_v1, %v284_v13  ;;  %v283_v56 = vmul.f32 %v1040_v2, %v256_v15  ;;  %731 = vmatprep.mubr.f32.mxu1 %v335_v54  ;;  %v338_v61 = vmul.f32 %v1057_v9, %v318_v14  ;;  %v1115_v1 = vld [vmem:[%s1194_s7 + $0x8] sm:$0xff] }
  0xe7   :  { %732 = vmatmul.mubr.f32.gmra.mxu1 %v336_v16 }
  0xe8   :  { %v303_v57 = vadd.f32 %v1047_v7, %v283_v56  ;;  %v337_v19 = vmul.f32 %v1052_v8, %v317_v17  ;;  %v320_v60 = vmax.f32 %v304_v18, 0.0  ;;  %v1120_v7 = vld [vmem:[%s1195_s8 + $0x8] sm:$0xff]  ;;  %v1125_v8 = vld [vmem:[%s1194_s7] sm:$0xff]  ;;  %s797_s7 = smov [#allocation2]  }
  0xea   :  { %v319_v21 = vmax.f32 %v303_v57, 0.0  ;;  %734 = vmatprep.mubr.f32.mxu1 %v337_v19  ;;  %v340_v23 = vmul.f32 %v1075_v24, %v320_v60  ;;  %v1131_v24 = vld [vmem:[%s1195_s8] sm:$0xff]  ;;  %s579_s8 = sshll.u32 %s797_s7, 4  ;;  %s580_s8 = int_to_ptr.vmem [resolvable:$true] %s579_s8 }
  0xeb   :  { %735 = vmatmul.mubr.f32.gmra.mxu1 %v338_v61  ;;  %s775_s25 = scalar_lea.vmem %s580_s8, 2048  ;;  %p780_p1 = scmp.lt.s32.totalorder %s580_s8, %s580_s8 }
  0xec   :  { %v339_v22 = vmul.f32 %v1068_v20, %v319_v21  ;;  %p776_p0 = scmp.ne.s32.totalorder %s580_s8, %s775_s25  ;;  %p781_p2 = scmp.lt.s32.totalorder %s775_s25, %s775_s25 }
  0xee   :  { %737 = vmatprep.mubr.f32.mxu1 %v339_v22  ;;  %p782_p3 = por %p781_p2, %p780_p1 }
  0xef   :  { %738 = vmatmul.mubr.f32.gmra.mxu1 %v340_v23 }
  0xf0   :  { %p783_p4 = pnand %p782_p3, %p776_p0 }
 0x193   :  { %v718_v2 = vpop.f32.mrf.mxu0 }
 0x194   :  { %v507_v9 = vmul.f32 %v718_v2, %v1115_v1 }
 0x195   :  { %v423_v20 = vpop.f32.mrf.mxu0 }
 0x196   :  { %v527_v26 = vadd.f32 %v1120_v7, %v507_v9  ;;  %v506_v27 = vmul.f32 %v1125_v8, %v423_v20 }
 0x197   :  { %v721_v28 = vpop.f32.mrf.mxu0 }
 0x198   :  { %v543_v31 = vmax.f32 %v527_v26, 0.0  ;;  %v526_v32 = vadd.f32 %v1131_v24, %v506_v27  ;;  %v509_v33 = vmul.f32 %v721_v28, %v1136_v25 }
 0x199   :  { %v433_v34 = vpop.f32.mrf.mxu0 }
 0x19a   :  { %559 = vst [vmem:[#allocation2 + $0x8] sm:$0xff] %v543_v31  ;;  %v542_v36 = vmax.f32 %v526_v32, 0.0  ;;  %v529_v37 = vadd.f32 %v1143_v29, %v509_v33  ;;  %v508_v38 = vmul.f32 %v1148_v30, %v433_v34 }
 0x19b   :  { %v724_v39 = vpop.f32.mrf.mxu0 }
 0x19c   :  { %558 = vst [vmem:[#allocation2] sm:$0xff] %v542_v36  ;;  %v545_v40 = vmax.f32 %v529_v37, 0.0  ;;  %v528_v41 = vadd.f32 %v1155_v35, %v508_v38  ;;  %v511_v42 = vmul.f32 %v724_v39, %v1115_v1 }
 0x19d   :  { %v443_v43 = vpop.f32.mrf.mxu0 }
 0x19e   :  { %561 = vst [vmem:[#allocation2 + $0x18] sm:$0xff] %v545_v40  ;;  %v544_v44 = vmax.f32 %v528_v41, 0.0  ;;  %v531_v45 = vadd.f32 %v1120_v7, %v511_v42  ;;  %v510_v46 = vmul.f32 %v1125_v8, %v443_v43 }
 0x19f   :  { %v727_v47 = vpop.f32.mrf.mxu1 }
 0x1a0   :  { %560 = vst [vmem:[#allocation2 + $0x10] sm:$0xff] %v544_v44  ;;  %v547_v48 = vmax.f32 %v531_v45, 0.0  ;;  %v530_v49 = vadd.f32 %v1131_v24, %v510_v46  ;;  %v513_v50 = vmul.f32 %v727_v47, %v1136_v25 }
 0x1a1   :  { %v453_v51 = vpop.f32.mrf.mxu1 }
 0x1a2   :  { %563 = vst [vmem:[#allocation2 + $0x28] sm:$0xff] %v547_v48  ;;  %v546_v52 = vmax.f32 %v530_v49, 0.0  ;;  %v533_v53 = vadd.f32 %v1143_v29, %v513_v50  ;;  %v512_v55 = vmul.f32 %v1148_v30, %v453_v51 }
 0x1a3   :  { %v730_v58 = vpop.f32.mrf.mxu1 }
 0x1a4   :  { %562 = vst [vmem:[#allocation2 + $0x20] sm:$0xff] %v546_v52  ;;  %v549_v59 = vmax.f32 %v533_v53, 0.0  ;;  %v532_v62 = vadd.f32 %v1155_v35, %v512_v55  ;;  %v515_v63 = vmul.f32 %v730_v58, %v1115_v1 }
 0x1a5   :  { %v463_v0 = vpop.f32.mrf.mxu1 }
 0x1a6   :  { %565 = vst [vmem:[#allocation2 + $0x38] sm:$0xff] %v549_v59  ;;  %v548_v3 = vmax.f32 %v532_v62, 0.0  ;;  %v535_v4 = vadd.f32 %v1120_v7, %v515_v63  ;;  %v514_v5 = vmul.f32 %v1125_v8, %v463_v0 }
 0x1a7   :  { %v733_v6 = vpop.f32.mrf.mxu1 }
 0x1a8   :  { %564 = vst [vmem:[#allocation2 + $0x30] sm:$0xff] %v548_v3  ;;  %v551_v10 = vmax.f32 %v535_v4, 0.0  ;;  %v534_v11 = vadd.f32 %v1131_v24, %v514_v5  ;;  %v517_v12 = vmul.f32 %v733_v6, %v1136_v25 }
 0x1a9   :  { %v473_v13 = vpop.f32.mrf.mxu1 }
 0x1aa   :  { %567 = vst [vmem:[#allocation2 + $0x48] sm:$0xff] %v551_v10  ;;  %v550_v54 = vmax.f32 %v534_v11, 0.0  ;;  %v537_v14 = vadd.f32 %v1143_v29, %v517_v12  ;;  %v516_v15 = vmul.f32 %v1148_v30, %v473_v13 }
 0x1ab   :  { %v736_v16 = vpop.f32.mrf.mxu1 }
 0x1ac   :  { %566 = vst [vmem:[#allocation2 + $0x40] sm:$0xff] %v550_v54  ;;  %v553_v17 = vmax.f32 %v537_v14, 0.0  ;;  %v536_v18 = vadd.f32 %v1155_v35, %v516_v15  ;;  %v519_v56 = vmul.f32 %v736_v16, %v1115_v1 }
 0x1ad   :  { %v483_v57 = vpop.f32.mrf.mxu1 }
 0x1ae   :  { %569 = vst [vmem:[#allocation2 + $0x58] sm:$0xff] %v553_v17  ;;  %v552_v19 = vmax.f32 %v536_v18, 0.0  ;;  %v539_v60 = vadd.f32 %v1120_v7, %v519_v56  ;;  %v518_v61 = vmul.f32 %v1125_v8, %v483_v57 }
 0x1af   :  { %v739_v21 = vpop.f32.mrf.mxu1 }
 0x1b0   :  { %568 = vst [vmem:[#allocation2 + $0x50] sm:$0xff] %v552_v19  ;;  %v555_v22 = vmax.f32 %v539_v60, 0.0  ;;  %v538_v23 = vadd.f32 %v1131_v24, %v518_v61  ;;  %v521_v2 = vmul.f32 %v739_v21, %v1136_v25 }
 0x1b1   :  { %v493_v9 = vpop.f32.mrf.mxu1 }
 0x1b2   :  { %571 = vst [vmem:[#allocation2 + $0x68] sm:$0xff] %v555_v22  ;;  %v554_v20 = vmax.f32 %v538_v23, 0.0  ;;  %v541_v26 = vadd.f32 %v1143_v29, %v521_v2  ;;  %v520_v1 = vmul.f32 %v1148_v30, %v493_v9 }
 0x1b4   :  { %570 = vst [vmem:[#allocation2 + $0x60] sm:$0xff] %v554_v20  ;;  %v557_v7 = vmax.f32 %v541_v26, 0.0  ;;  %v540_v8 = vadd.f32 %v1155_v35, %v520_v1 }
 0x1b6   :  { %573 = vst [vmem:[#allocation2 + $0x78] sm:$0xff] %v557_v7  ;;  %v556_v27 = vmax.f32 %v540_v8, 0.0 }
 0x1b8   :  { %572 = vst [vmem:[#allocation2 + $0x70] sm:$0xff] %v556_v27 }
 0x1b9   :  { %786 = shalt.err (!%p783_p4)
}
 0x1ba   :  { %s798_s0 = smov 128   ;;  %s799_s26 = smov 8  }
 0x1bb   :  { %585 = dma.vmem_to_hbm [thread:$0]  %s580_s8, 2048, %s1196_s9, [#allocation3], %s798_s0, %s798_s0, %s799_s26  }
 0x1bc   :  { %795 = dma.done.wait [#allocation3], 2048  }
 0x1bd   :  { %796 = vsyncadd [#allocation3], 4294965248 }
 0x1be   :  { %589 = vsyncpa [#allocation3], 1 }

</bundles_post_ra>
